<compile_context>
chip_gen: v5e
topology: v5e:2x2
jax: 0.10.0
libtpu: 0.0.40
codegen_flags: <defaults>
</compile_context>

<pallas_src>
import functools
import math

import jax
import jax.numpy as jnp
from jax import lax
from jax.experimental import pallas as pl
from jax.experimental.pallas import tpu as pltpu

EPS = 1e-5          # nn.BatchNorm2d default eps
_LANE = 128
_SUBLANE = 8        # float32 sublane tile


def _rup(x, m):
    return (x + m - 1) // m * m


def _pick_tile(l, row_lanes, n_chan, budget_bytes):
    """Largest tile length (lanes) that (a) is a multiple of `row_lanes` and of
    128, (b) divides L, and (c) keeps the double-buffered f32 activation blocks
    of `n_chan` channels within `budget_bytes`."""
    base = row_lanes * (_LANE // math.gcd(row_lanes, _LANE))   # lcm(row, 128)
    if l % base != 0:
        return l                                   # fallback: single tile
    max_lanes = max(base, budget_bytes // (8 * max(n_chan, 1)))
    tl = base
    while tl * 2 <= max_lanes and l % (tl * 2) == 0:
        tl *= 2
    return tl


def _vmem_limit(c_inp, c_outp, tl, ks):
    """Derive vmem_limit_bytes from the actual per-grid-step footprint."""
    act = 4 * tl * (c_inp + c_outp) * 2              # double-buffered x / y blocks
    resident = 4 * (ks * tl + ks * c_outp * c_inp + 2 * c_inp + 4 * c_outp)
    temps = 4 * tl * (c_inp + 2 * c_outp)            # rolled taps + f32 accumulator
    return int(min(max(act + resident + temps + (4 << 20), 16 << 20), 64 << 20))


def _conv_relu_stats_kernel(x_ref, mask_ref, w_ref, b_ref, scale_ref, shift_ref,
                            y_ref, sum_ref, sq_ref,
                            *, ksize, step, apply_in_affine):
    """One L-tile of: [optional per-channel affine (previous BN folded)] ->
    SAME conv along one spatial axis (k taps at stride `step` in the flattened
    layout) -> bias -> ReLU, plus per-channel sum / sum-of-squares accumulated
    across the grid for the following BatchNorm."""
    # Zero the cross-tile stats accumulators on the first grid step.
    @pl.when(pl.program_id(0) == 0)
    def _():
        sum_ref[...] = jnp.zeros_like(sum_ref)
        sq_ref[...] = jnp.zeros_like(sq_ref)

    x = x_ref[...]
    if apply_in_affine:
        # Previous BatchNorm folded to per-channel scale/shift (2 ops/elem).
        x = x * scale_ref[...] + shift_ref[...]

    c_out, tl = y_ref.shape
    half = ksize // 2
    acc = jnp.zeros((c_out, tl), jnp.float32)
    for t in range(ksize):
        off = t - half
        if off == 0:
            tap = x                                # center tap: no shift, no mask
        else:
            # Shifted tap via XLU roll (free slot); wrapped-around lanes are
            # exactly the SAME-padding positions, zeroed by the 0/1 mask.
            tap = pltpu.roll(x, (-off * step) % tl, axis=1) * mask_ref[pl.ds(t, 1), :]
        acc += lax.dot_general(w_ref[t], tap,
                               dimension_numbers=(((1,), (0,)), ((), ())),
                               preferred_element_type=jnp.float32)

    y = jnp.maximum(acc + b_ref[...], 0.0)           # conv bias + ReLU
    y_ref[...] = y                                   # lane-dense store

    # BatchNorm statistics (biased variance via E[x^2]-E[x]^2, clamped later).
    sum_ref[...] += jnp.sum(y, axis=1, keepdims=True)
    sq_ref[...] += jnp.sum(y * y, axis=1, keepdims=True)


def _affine_kernel(x_ref, scale_ref, shift_ref, o_ref):
    """Final BatchNorm application: per-channel scale/shift, lane-dense."""
    o_ref[...] = x_ref[...] * scale_ref[...] + shift_ref[...]


def _stats_to_affine(ssum, ssq, gamma, beta, count):
    """Fold training-mode BatchNorm stats into per-channel scale/shift."""
    mean = ssum / count
    var = jnp.maximum(ssq / count - mean * mean, 0.0)   # biased variance
    scale = gamma * lax.rsqrt(var + EPS)
    return scale, beta - mean * scale


def separated_conv(x_nchw, params, *, act_vmem_budget_bytes=8 << 20):
    """Forward pass of Separated_Conv. x: (N, Cin, H, W) -> (N, Cout, H, W)."""
    (w1, b1, g1, be1), (w2, b2, g2, be2) = params
    n, c_in, h, w = x_nchw.shape
    c_out = w1.shape[0]
    ksize = w1.shape[3]
    assert w1.shape[2] == 1 and w2.shape[3] == 1 and w2.shape[2] == ksize
    assert ksize % 2 == 1
    l = n * h * w
    assert l % _LANE == 0, "N*H*W must be a multiple of 128"

    cp_in = _rup(c_in, _SUBLANE)
    cp_out = _rup(c_out, _SUBLANE)

    # ---- layout plumbing (plain JAX, outside the kernels) ----
    xt = jnp.transpose(x_nchw.astype(jnp.float32), (1, 0, 2, 3)).reshape(c_in, l)
    xt = jnp.pad(xt, ((0, cp_in - c_in), (0, 0)))         # (cp_in, L)

    def prep_w(w_oik, ci_p, co_p):                         # (Cout,Cin,k)->(k,co_p,ci_p)
        co, ci, k = w_oik.shape
        wt = jnp.transpose(w_oik.astype(jnp.float32), (2, 0, 1))
        return jnp.pad(wt, ((0, 0), (0, co_p - co), (0, ci_p - ci)))

    w1m = prep_w(w1[:, :, 0, :], cp_in, cp_out)            # (1,k) conv: taps along W
    w2m = prep_w(w2[:, :, :, 0], cp_out, cp_out)           # (k,1) conv: taps along H

    def prep_vec(v):
        return jnp.pad(v.astype(jnp.float32), (0, cp_out - c_out))[:, None]

    b1v, g1v, be1v = prep_vec(b1), prep_vec(g1), prep_vec(be1)
    b2v, g2v, be2v = prep_vec(b2), prep_vec(g2), prep_vec(be2)
    ones_in = jnp.ones((cp_in, 1), jnp.float32)
    zeros_in = jnp.zeros((cp_in, 1), jnp.float32)

    # ---- tiling of the flattened L = N*H*W axis ----
    tl1 = _pick_tile(l, w, cp_in + cp_out, act_vmem_budget_bytes)     # W-row aligned
    tl2 = _pick_tile(l, h * w, 2 * cp_out, act_vmem_budget_bytes)     # image aligned
    tlc = _pick_tile(l, 1, 2 * cp_out, act_vmem_budget_bytes)

    def make_mask(tl, row_len, row_stride):
        # mask[t, l] = 1 if tap offset (t - k//2) stays inside its row of
        # length `row_len` (stride `row_stride` in the flattened layout).
        pos = (jnp.arange(tl, dtype=jnp.int32) // row_stride) % row_len
        offs = jnp.arange(ksize, dtype=jnp.int32)[:, None] - ksize // 2
        valid = (pos[None, :] + offs >= 0) & (pos[None, :] + offs < row_len)
        return valid.astype(jnp.float32)

    mask1 = make_mask(tl1, w, 1)           # conv along W (stride 1 in L)
    mask2 = make_mask(tl2, h, w)           # conv along H (stride W in L)

    def run_stage(x_cl, mask, wm, bv, scale, shift, c_inp, tl, step, apply_affine):
        n_tiles = l // tl
        kern = functools.partial(_conv_relu_stats_kernel, ksize=ksize, step=step,
                                 apply_in_affine=apply_affine)
        flops = 2 * ksize * c_inp * cp_out * l + 8 * cp_out * l
        bytes_accessed = 4 * ((c_inp + cp_out) * l + ksize * c_inp * cp_out)
        return pl.pallas_call(
            kern,
            grid_spec=pltpu.PrefetchScalarGridSpec(
                num_scalar_prefetch=0,
                grid=(n_tiles,),
                in_specs=[
                    pl.BlockSpec((c_inp, tl), lambda i: (0, i)),              # x tile
                    pl.BlockSpec((ksize, tl), lambda i: (0, 0)),              # pad mask
                    pl.BlockSpec((ksize, cp_out, c_inp), lambda i: (0, 0, 0)),  # taps
                    pl.BlockSpec((cp_out, 1), lambda i: (0, 0)),              # conv bias
                    pl.BlockSpec((c_inp, 1), lambda i: (0, 0)),               # prev-BN scale
                    pl.BlockSpec((c_inp, 1), lambda i: (0, 0)),               # prev-BN shift
                ],
                out_specs=[
                    pl.BlockSpec((cp_out, tl), lambda i: (0, i)),             # conv+ReLU
                    pl.BlockSpec((cp_out, 1), lambda i: (0, 0)),              # sum accum
                    pl.BlockSpec((cp_out, 1), lambda i: (0, 0)),              # sumsq accum
                ]),
            out_shape=(jax.ShapeDtypeStruct((cp_out, l), jnp.float32),
                       jax.ShapeDtypeStruct((cp_out, 1), jnp.float32),
                       jax.ShapeDtypeStruct((cp_out, 1), jnp.float32)),
            compiler_params=pltpu.CompilerParams(
                dimension_semantics=("arbitrary",),   # stats accumulate across tiles
                vmem_limit_bytes=_vmem_limit(c_inp, cp_out, tl, ksize)),
            cost_estimate=pl.CostEstimate(flops=int(flops), transcendentals=0,
                                          bytes_accessed=int(bytes_accessed)),
        )(x_cl, mask, wm, bv, scale, shift)

    # Stage 1: (1,k) conv along W -> ReLU, with BN1 stats.
    y1, s1, q1 = run_stage(xt, mask1, w1m, b1v, ones_in, zeros_in,
                           cp_in, tl1, 1, False)
    scale1, shift1 = _stats_to_affine(s1, q1, g1v, be1v, float(l))

    # Stage 2: BN1 apply (folded) -> (k,1) conv along H -> ReLU, with BN2 stats.
    y2, s2, q2 = run_stage(y1, mask2, w2m, b2v, scale1, shift1,
                           cp_out, tl2, w, True)
    scale2, shift2 = _stats_to_affine(s2, q2, g2v, be2v, float(l))

    # BN2 apply: tiny elementwise kernel, "parallel" grid (megacore-shardable).
    out_t = pl.pallas_call(
        _affine_kernel,
        grid_spec=pltpu.PrefetchScalarGridSpec(
            num_scalar_prefetch=0,
            grid=(l // tlc,),
            in_specs=[pl.BlockSpec((cp_out, tlc), lambda i: (0, i)),
                      pl.BlockSpec((cp_out, 1), lambda i: (0, 0)),
                      pl.BlockSpec((cp_out, 1), lambda i: (0, 0))],
            out_specs=pl.BlockSpec((cp_out, tlc), lambda i: (0, i))),
        out_shape=jax.ShapeDtypeStruct((cp_out, l), jnp.float32),
        compiler_params=pltpu.CompilerParams(
            dimension_semantics=("parallel",),
            vmem_limit_bytes=_vmem_limit(cp_out, cp_out, tlc, 1)),
    )(y2, scale2, shift2)

    y = out_t[:c_out].reshape(c_out, n, h, w)
    return jnp.transpose(y, (1, 0, 2, 3))                 # back to NCHW


def init_params(key, c_in, c_out, ksize=3):
    """Synthetic parameters with the same shapes as the nn.Module (OIHW weights)."""
    def one(k, w_shape):
        k1, k2, k3, k4 = jax.random.split(k, 4)
        w = 0.1 * jax.random.normal(k1, w_shape, jnp.float32)
        b = 0.1 * jax.random.normal(k2, (c_out,), jnp.float32)
        g = 1.0 + 0.1 * jax.random.normal(k3, (c_out,), jnp.float32)
        be = 0.1 * jax.random.normal(k4, (c_out,), jnp.float32)
        return (w, b, g, be)
    k1, k2 = jax.random.split(key)
    p1 = one(k1, (c_out, c_in, 1, ksize))      # Conv2d kernel_size=(1, k)
    p2 = one(k2, (c_out, c_out, ksize, 1))     # Conv2d kernel_size=(k, 1)
    return (p1, p2)


def reference(x, params):
    """Pure-JAX f32 reference of the PyTorch training-mode forward."""
    (w1, b1, g1, be1), (w2, b2, g2, be2) = params
    p = w1.shape[3] // 2

    def block(x, w, b, g, be, pad_hw):
        y = lax.conv_general_dilated(
            x, w, window_strides=(1, 1), padding=pad_hw,
            dimension_numbers=('NCHW', 'OIHW', 'NCHW'),
            precision=lax.Precision.HIGHEST)
        y = jnp.maximum(y + b[None, :, None, None], 0.0)
        mean = jnp.mean(y, axis=(0, 2, 3), keepdims=True)
        var = jnp.mean((y - mean) ** 2, axis=(0, 2, 3), keepdims=True)
        return (y - mean) / jnp.sqrt(var + EPS) * g[None, :, None, None] \
            + be[None, :, None, None]

    x = block(x.astype(jnp.float32), w1, b1, g1, be1, ((0, 0), (p, p)))   # (1,k)
    x = block(x, w2, b2, g2, be2, ((p, p), (0, 0)))                       # (k,1)
    return x


if __name__ == "__main__":
    key = jax.random.PRNGKey(0)
    k_x, k_p = jax.random.split(key)

    N, C_IN, H, W = 2, 4, 16, 16
    C_OUT, KSIZE = 8, 3
    x = jax.random.normal(k_x, (N, C_IN, H, W), jnp.float32)
    params = init_params(k_p, C_IN, C_OUT, KSIZE)

    # Small activation budget so that even these toy shapes exercise the
    # multi-tile grid / cross-tile BatchNorm-stats accumulation path.
    fwd = jax.jit(functools.partial(separated_conv, act_vmem_budget_bytes=4096))
    out = jax.block_until_ready(fwd(x, params))
    assert out.shape == (N, C_OUT, H, W), out.shape

    ref = reference(x, params)
    err = float(jnp.max(jnp.abs(out - ref)))
    assert jnp.allclose(out, ref, atol=2e-2, rtol=2e-2), f"max abs err {err}"

    print("KERNEL_OK")
</pallas_src>

<mosaic_0001>
module attributes {stable_mosaic.version = 11 : i64} {
  func.func @_conv_relu_stats_kernel(%arg0: i32, %arg1: memref<8x128xf32, #tpu.memory_space<vmem>>, %arg2: memref<3x128xf32, #tpu.memory_space<vmem>>, %arg3: memref<3x8x8xf32, #tpu.memory_space<vmem>>, %arg4: memref<8x1xf32, #tpu.memory_space<vmem>>, %arg5: memref<8x1xf32, #tpu.memory_space<vmem>>, %arg6: memref<8x1xf32, #tpu.memory_space<vmem>>, %arg7: memref<8x128xf32, #tpu.memory_space<vmem>>, %arg8: memref<8x1xf32, #tpu.memory_space<vmem>>, %arg9: memref<8x1xf32, #tpu.memory_space<vmem>>) attributes {dimension_semantics = [#tpu.dimension_semantics<arbitrary>], iteration_bounds = array<i64: 4>, scalar_prefetch = 0 : i64, scratch_operands = 0 : i64, tpu.core_type = #tpu.core_type<tc>, window_params = [{transform_indices = @transform_0, window_bounds = array<i64: 8, 128>}, {pipeline_mode = #tpu.pipeline_mode<synchronous>, transform_indices = @transform_1, window_bounds = array<i64: 3, 128>}, {pipeline_mode = #tpu.pipeline_mode<synchronous>, transform_indices = @transform_2, window_bounds = array<i64: 3, 8, 8>}, {pipeline_mode = #tpu.pipeline_mode<synchronous>, transform_indices = @transform_3, window_bounds = array<i64: 8, 1>}, {pipeline_mode = #tpu.pipeline_mode<synchronous>, transform_indices = @transform_4, window_bounds = array<i64: 8, 1>}, {pipeline_mode = #tpu.pipeline_mode<synchronous>, transform_indices = @transform_5, window_bounds = array<i64: 8, 1>}, {transform_indices = @transform_6, window_bounds = array<i64: 8, 128>}, {pipeline_mode = #tpu.pipeline_mode<synchronous>, transform_indices = @transform_7, window_bounds = array<i64: 8, 1>}, {pipeline_mode = #tpu.pipeline_mode<synchronous>, transform_indices = @transform_8, window_bounds = array<i64: 8, 1>}]} {
    %c0_i32 = arith.constant 0 : i32
    %0 = arith.cmpi eq, %arg0, %c0_i32 : i32
    %1 = arith.extui %0 : i1 to i32
    %c0_i32_0 = arith.constant 0 : i32
    %2 = arith.cmpi ne, %1, %c0_i32_0 : i32
    scf.if %2 {
      %cst_31 = arith.constant 0.000000e+00 : f32
      %42 = vector.broadcast %cst_31 : f32 to vector<8x1xf32>
      %c0_32 = arith.constant 0 : index
      %c0_33 = arith.constant 0 : index
      %43 = vector.load %arg8[%c0_32, %c0_33] : memref<8x1xf32, #tpu.memory_space<vmem>>, vector<8x1xf32>
      tpu.vector_store %arg8[%c0_32, %c0_33], %42 {strides = array<i32>} : memref<8x1xf32, #tpu.memory_space<vmem>>, vector<8x1xf32>,
      %cst_34 = arith.constant 0.000000e+00 : f32
      %44 = vector.broadcast %cst_34 : f32 to vector<8x1xf32>
      %c0_35 = arith.constant 0 : index
      %c0_36 = arith.constant 0 : index
      %45 = vector.load %arg9[%c0_35, %c0_36] : memref<8x1xf32, #tpu.memory_space<vmem>>, vector<8x1xf32>
      tpu.vector_store %arg9[%c0_35, %c0_36], %44 {strides = array<i32>} : memref<8x1xf32, #tpu.memory_space<vmem>>, vector<8x1xf32>,
    } else {
    }
    %c0 = arith.constant 0 : index
    %c0_1 = arith.constant 0 : index
    %3 = vector.load %arg1[%c0, %c0_1] : memref<8x128xf32, #tpu.memory_space<vmem>>, vector<8x128xf32>
    %cst = arith.constant 0.000000e+00 : f32
    %4 = vector.broadcast %cst : f32 to vector<8x128xf32>
    %c1_i32 = arith.constant 1 : i32
    %5 = tpu.dynamic_rotate %3 by %c1_i32 dim 1 : vector<8x128xf32>, i32 -> vector<8x128xf32>
    %c0_2 = arith.constant 0 : index
    %c0_3 = arith.constant 0 : index
    %6 = vector.load %arg2[%c0_2, %c0_3] : memref<3x128xf32, #tpu.memory_space<vmem>>, vector<1x128xf32>
    %7 = vector.broadcast %6 : vector<1x128xf32> to vector<8x128xf32>
    %8 = arith.mulf %5, %7 : vector<8x128xf32>
    %c0_4 = arith.constant 0 : index
    %c0_5 = arith.constant 0 : index
    %c0_6 = arith.constant 0 : index
    %9 = vector.load %arg3[%c0_4, %c0_5, %c0_6] : memref<3x8x8xf32, #tpu.memory_space<vmem>>, vector<1x8x8xf32>
    %10 = vector.shape_cast %9 : vector<1x8x8xf32> to vector<8x8xf32>
    %cst_7 = arith.constant dense<0.000000e+00> : vector<8x128xf32>
    %11 = tpu.matmul %10, %8, %cst_7 {dimension_numbers = #tpu.dot_dimension_numbers<[1], [0], [0], [1], [0, 0, 1, 1], [], []>} : vector<8x8xf32>, vector<8x128xf32>, vector<8x128xf32> -> vector<8x128xf32>
    %12 = arith.addf %4, %11 : vector<8x128xf32>
    %c1 = arith.constant 1 : index
    %c0_8 = arith.constant 0 : index
    %c0_9 = arith.constant 0 : index
    %13 = vector.load %arg3[%c1, %c0_8, %c0_9] : memref<3x8x8xf32, #tpu.memory_space<vmem>>, vector<1x8x8xf32>
    %14 = vector.shape_cast %13 : vector<1x8x8xf32> to vector<8x8xf32>
    %cst_10 = arith.constant dense<0.000000e+00> : vector<8x128xf32>
    %15 = tpu.matmul %14, %3, %cst_10 {dimension_numbers = #tpu.dot_dimension_numbers<[1], [0], [0], [1], [0, 0, 1, 1], [], []>} : vector<8x8xf32>, vector<8x128xf32>, vector<8x128xf32> -> vector<8x128xf32>
    %16 = arith.addf %12, %15 : vector<8x128xf32>
    %c127_i32 = arith.constant 127 : i32
    %17 = tpu.dynamic_rotate %3 by %c127_i32 dim 1 : vector<8x128xf32>, i32 -> vector<8x128xf32>
    %c2 = arith.constant 2 : index
    %c0_11 = arith.constant 0 : index
    %18 = vector.load %arg2[%c2, %c0_11] : memref<3x128xf32, #tpu.memory_space<vmem>>, vector<1x128xf32>
    %19 = vector.broadcast %18 : vector<1x128xf32> to vector<8x128xf32>
    %20 = arith.mulf %17, %19 : vector<8x128xf32>
    %c2_12 = arith.constant 2 : index
    %c0_13 = arith.constant 0 : index
    %c0_14 = arith.constant 0 : index
    %21 = vector.load %arg3[%c2_12, %c0_13, %c0_14] : memref<3x8x8xf32, #tpu.memory_space<vmem>>, vector<1x8x8xf32>
    %22 = vector.shape_cast %21 : vector<1x8x8xf32> to vector<8x8xf32>
    %cst_15 = arith.constant dense<0.000000e+00> : vector<8x128xf32>
    %23 = tpu.matmul %22, %20, %cst_15 {dimension_numbers = #tpu.dot_dimension_numbers<[1], [0], [0], [1], [0, 0, 1, 1], [], []>} : vector<8x8xf32>, vector<8x128xf32>, vector<8x128xf32> -> vector<8x128xf32>
    %24 = arith.addf %16, %23 : vector<8x128xf32>
    %c0_16 = arith.constant 0 : index
    %c0_17 = arith.constant 0 : index
    %25 = vector.load %arg4[%c0_16, %c0_17] : memref<8x1xf32, #tpu.memory_space<vmem>>, vector<8x1xf32>
    %26 = vector.broadcast %25 : vector<8x1xf32> to vector<8x128xf32>
    %27 = arith.addf %24, %26 : vector<8x128xf32>
    %cst_18 = arith.constant 0.000000e+00 : f32
    %28 = vector.broadcast %cst_18 : f32 to vector<8x128xf32>
    %29 = arith.maximumf %27, %28 : vector<8x128xf32>
    %c0_19 = arith.constant 0 : index
    %c0_20 = arith.constant 0 : index
    %30 = vector.load %arg7[%c0_19, %c0_20] : memref<8x128xf32, #tpu.memory_space<vmem>>, vector<8x128xf32>
    tpu.vector_store %arg7[%c0_19, %c0_20], %29 {strides = array<i32>} : memref<8x128xf32, #tpu.memory_space<vmem>>, vector<8x128xf32>,
    %c0_21 = arith.constant 0 : index
    %c0_22 = arith.constant 0 : index
    %31 = vector.load %arg8[%c0_21, %c0_22] : memref<8x1xf32, #tpu.memory_space<vmem>>, vector<8x1xf32>
    %cst_23 = arith.constant dense<0.000000e+00> : vector<8xf32>
    %32 = vector.multi_reduction <add>, %29, %cst_23 [1] : vector<8x128xf32> to vector<8xf32>
    %33 = vector.shape_cast %32 : vector<8xf32> to vector<8x1xf32>
    %34 = arith.addf %31, %33 : vector<8x1xf32>
    %c0_24 = arith.constant 0 : index
    %c0_25 = arith.constant 0 : index
    %35 = vector.load %arg8[%c0_24, %c0_25] : memref<8x1xf32, #tpu.memory_space<vmem>>, vector<8x1xf32>
    tpu.vector_store %arg8[%c0_24, %c0_25], %34 {strides = array<i32>} : memref<8x1xf32, #tpu.memory_space<vmem>>, vector<8x1xf32>,
    %c0_26 = arith.constant 0 : index
    %c0_27 = arith.constant 0 : index
    %36 = vector.load %arg9[%c0_26, %c0_27] : memref<8x1xf32, #tpu.memory_space<vmem>>, vector<8x1xf32>
    %37 = arith.mulf %29, %29 : vector<8x128xf32>
    %cst_28 = arith.constant dense<0.000000e+00> : vector<8xf32>
    %38 = vector.multi_reduction <add>, %37, %cst_28 [1] : vector<8x128xf32> to vector<8xf32>
    %39 = vector.shape_cast %38 : vector<8xf32> to vector<8x1xf32>
    %40 = arith.addf %36, %39 : vector<8x1xf32>
    %c0_29 = arith.constant 0 : index
    %c0_30 = arith.constant 0 : index
    %41 = vector.load %arg9[%c0_29, %c0_30] : memref<8x1xf32, #tpu.memory_space<vmem>>, vector<8x1xf32>
    tpu.vector_store %arg9[%c0_29, %c0_30], %40 {strides = array<i32>} : memref<8x1xf32, #tpu.memory_space<vmem>>, vector<8x1xf32>,
    return
  }
  func.func @transform_0(%arg0: i32) -> (i32, i32) {
    %c0_i32 = arith.constant 0 : i32
    %c0_i32_0 = arith.constant 0 : i32
    return %c0_i32, %arg0 : i32, i32
  }
  func.func @transform_1(%arg0: i32) -> (i32, i32) {
    %c0_i32 = arith.constant 0 : i32
    %c0_i32_0 = arith.constant 0 : i32
    %c0_i32_1 = arith.constant 0 : i32
    return %c0_i32, %c0_i32_0 : i32, i32
  }
  func.func @transform_2(%arg0: i32) -> (i32, i32, i32) {
    %c0_i32 = arith.constant 0 : i32
    %c0_i32_0 = arith.constant 0 : i32
    %c0_i32_1 = arith.constant 0 : i32
    %c0_i32_2 = arith.constant 0 : i32
    return %c0_i32, %c0_i32_0, %c0_i32_1 : i32, i32, i32
  }
  func.func @transform_3(%arg0: i32) -> (i32, i32) {
    %c0_i32 = arith.constant 0 : i32
    %c0_i32_0 = arith.constant 0 : i32
    %c0_i32_1 = arith.constant 0 : i32
    return %c0_i32, %c0_i32_0 : i32, i32
  }
  func.func @transform_4(%arg0: i32) -> (i32, i32) {
    %c0_i32 = arith.constant 0 : i32
    %c0_i32_0 = arith.constant 0 : i32
    %c0_i32_1 = arith.constant 0 : i32
    return %c0_i32, %c0_i32_0 : i32, i32
  }
  func.func @transform_5(%arg0: i32) -> (i32, i32) {
    %c0_i32 = arith.constant 0 : i32
    %c0_i32_0 = arith.constant 0 : i32
    %c0_i32_1 = arith.constant 0 : i32
    return %c0_i32, %c0_i32_0 : i32, i32
  }
  func.func @transform_6(%arg0: i32) -> (i32, i32) {
    %c0_i32 = arith.constant 0 : i32
    %c0_i32_0 = arith.constant 0 : i32
    return %c0_i32, %arg0 : i32, i32
  }
  func.func @transform_7(%arg0: i32) -> (i32, i32) {
    %c0_i32 = arith.constant 0 : i32
    %c0_i32_0 = arith.constant 0 : i32
    %c0_i32_1 = arith.constant 0 : i32
    return %c0_i32, %c0_i32_0 : i32, i32
  }
  func.func @transform_8(%arg0: i32) -> (i32, i32) {
    %c0_i32 = arith.constant 0 : i32
    %c0_i32_0 = arith.constant 0 : i32
    %c0_i32_1 = arith.constant 0 : i32
    return %c0_i32, %c0_i32_0 : i32, i32
  }
}

module attributes {stable_mosaic.version = 11 : i64} {
  func.func @_affine_kernel(%arg0: i32, %arg1: memref<8x128xf32, #tpu.memory_space<vmem>>, %arg2: memref<8x1xf32, #tpu.memory_space<vmem>>, %arg3: memref<8x1xf32, #tpu.memory_space<vmem>>, %arg4: memref<8x128xf32, #tpu.memory_space<vmem>>) attributes {dimension_semantics = [#tpu.dimension_semantics<parallel>], iteration_bounds = array<i64: 4>, scalar_prefetch = 0 : i64, scratch_operands = 0 : i64, tpu.core_type = #tpu.core_type<tc>, window_params = [{transform_indices = @transform_0, window_bounds = array<i64: 8, 128>}, {pipeline_mode = #tpu.pipeline_mode<synchronous>, transform_indices = @transform_1, window_bounds = array<i64: 8, 1>}, {pipeline_mode = #tpu.pipeline_mode<synchronous>, transform_indices = @transform_2, window_bounds = array<i64: 8, 1>}, {transform_indices = @transform_3, window_bounds = array<i64: 8, 128>}]} {
    %c0 = arith.constant 0 : index
    %c0_0 = arith.constant 0 : index
    %0 = vector.load %arg1[%c0, %c0_0] : memref<8x128xf32, #tpu.memory_space<vmem>>, vector<8x128xf32>
    %c0_1 = arith.constant 0 : index
    %c0_2 = arith.constant 0 : index
    %1 = vector.load %arg2[%c0_1, %c0_2] : memref<8x1xf32, #tpu.memory_space<vmem>>, vector<8x1xf32>
    %2 = vector.broadcast %1 : vector<8x1xf32> to vector<8x128xf32>
    %3 = arith.mulf %0, %2 : vector<8x128xf32>
    %c0_3 = arith.constant 0 : index
    %c0_4 = arith.constant 0 : index
    %4 = vector.load %arg3[%c0_3, %c0_4] : memref<8x1xf32, #tpu.memory_space<vmem>>, vector<8x1xf32>
    %5 = vector.broadcast %4 : vector<8x1xf32> to vector<8x128xf32>
    %6 = arith.addf %3, %5 : vector<8x128xf32>
    %c0_5 = arith.constant 0 : index
    %c0_6 = arith.constant 0 : index
    %7 = vector.load %arg4[%c0_5, %c0_6] : memref<8x128xf32, #tpu.memory_space<vmem>>, vector<8x128xf32>
    tpu.vector_store %arg4[%c0_5, %c0_6], %6 {strides = array<i32>} : memref<8x128xf32, #tpu.memory_space<vmem>>, vector<8x128xf32>,
    return
  }
  func.func @transform_0(%arg0: i32) -> (i32, i32) {
    %c0_i32 = arith.constant 0 : i32
    %c0_i32_0 = arith.constant 0 : i32
    return %c0_i32, %arg0 : i32, i32
  }
  func.func @transform_1(%arg0: i32) -> (i32, i32) {
    %c0_i32 = arith.constant 0 : i32
    %c0_i32_0 = arith.constant 0 : i32
    %c0_i32_1 = arith.constant 0 : i32
    return %c0_i32, %c0_i32_0 : i32, i32
  }
  func.func @transform_2(%arg0: i32) -> (i32, i32) {
    %c0_i32 = arith.constant 0 : i32
    %c0_i32_0 = arith.constant 0 : i32
    %c0_i32_1 = arith.constant 0 : i32
    return %c0_i32, %c0_i32_0 : i32, i32
  }
  func.func @transform_3(%arg0: i32) -> (i32, i32) {
    %c0_i32 = arith.constant 0 : i32
    %c0_i32_0 = arith.constant 0 : i32
    return %c0_i32, %arg0 : i32, i32
  }
}

module attributes {stable_mosaic.version = 11 : i64} {
  func.func @_conv_relu_stats_kernel(%arg0: i32, %arg1: memref<8x256xf32, #tpu.memory_space<vmem>>, %arg2: memref<3x256xf32, #tpu.memory_space<vmem>>, %arg3: memref<3x8x8xf32, #tpu.memory_space<vmem>>, %arg4: memref<8x1xf32, #tpu.memory_space<vmem>>, %arg5: memref<8x1xf32, #tpu.memory_space<vmem>>, %arg6: memref<8x1xf32, #tpu.memory_space<vmem>>, %arg7: memref<8x256xf32, #tpu.memory_space<vmem>>, %arg8: memref<8x1xf32, #tpu.memory_space<vmem>>, %arg9: memref<8x1xf32, #tpu.memory_space<vmem>>) attributes {dimension_semantics = [#tpu.dimension_semantics<arbitrary>], iteration_bounds = array<i64: 2>, scalar_prefetch = 0 : i64, scratch_operands = 0 : i64, tpu.core_type = #tpu.core_type<tc>, window_params = [{transform_indices = @transform_0, window_bounds = array<i64: 8, 256>}, {pipeline_mode = #tpu.pipeline_mode<synchronous>, transform_indices = @transform_1, window_bounds = array<i64: 3, 256>}, {pipeline_mode = #tpu.pipeline_mode<synchronous>, transform_indices = @transform_2, window_bounds = array<i64: 3, 8, 8>}, {pipeline_mode = #tpu.pipeline_mode<synchronous>, transform_indices = @transform_3, window_bounds = array<i64: 8, 1>}, {pipeline_mode = #tpu.pipeline_mode<synchronous>, transform_indices = @transform_4, window_bounds = array<i64: 8, 1>}, {pipeline_mode = #tpu.pipeline_mode<synchronous>, transform_indices = @transform_5, window_bounds = array<i64: 8, 1>}, {transform_indices = @transform_6, window_bounds = array<i64: 8, 256>}, {pipeline_mode = #tpu.pipeline_mode<synchronous>, transform_indices = @transform_7, window_bounds = array<i64: 8, 1>}, {pipeline_mode = #tpu.pipeline_mode<synchronous>, transform_indices = @transform_8, window_bounds = array<i64: 8, 1>}]} {
    %c0_i32 = arith.constant 0 : i32
    %0 = arith.cmpi eq, %arg0, %c0_i32 : i32
    %1 = arith.extui %0 : i1 to i32
    %c0_i32_0 = arith.constant 0 : i32
    %2 = arith.cmpi ne, %1, %c0_i32_0 : i32
    scf.if %2 {
      %cst_35 = arith.constant 0.000000e+00 : f32
      %48 = vector.broadcast %cst_35 : f32 to vector<8x1xf32>
      %c0_36 = arith.constant 0 : index
      %c0_37 = arith.constant 0 : index
      %49 = vector.load %arg8[%c0_36, %c0_37] : memref<8x1xf32, #tpu.memory_space<vmem>>, vector<8x1xf32>
      tpu.vector_store %arg8[%c0_36, %c0_37], %48 {strides = array<i32>} : memref<8x1xf32, #tpu.memory_space<vmem>>, vector<8x1xf32>,
      %cst_38 = arith.constant 0.000000e+00 : f32
      %50 = vector.broadcast %cst_38 : f32 to vector<8x1xf32>
      %c0_39 = arith.constant 0 : index
      %c0_40 = arith.constant 0 : index
      %51 = vector.load %arg9[%c0_39, %c0_40] : memref<8x1xf32, #tpu.memory_space<vmem>>, vector<8x1xf32>
      tpu.vector_store %arg9[%c0_39, %c0_40], %50 {strides = array<i32>} : memref<8x1xf32, #tpu.memory_space<vmem>>, vector<8x1xf32>,
    } else {
    }
    %c0 = arith.constant 0 : index
    %c0_1 = arith.constant 0 : index
    %3 = vector.load %arg1[%c0, %c0_1] : memref<8x256xf32, #tpu.memory_space<vmem>>, vector<8x256xf32>
    %c0_2 = arith.constant 0 : index
    %c0_3 = arith.constant 0 : index
    %4 = vector.load %arg5[%c0_2, %c0_3] : memref<8x1xf32, #tpu.memory_space<vmem>>, vector<8x1xf32>
    %5 = vector.broadcast %4 : vector<8x1xf32> to vector<8x256xf32>
    %6 = arith.mulf %3, %5 : vector<8x256xf32>
    %c0_4 = arith.constant 0 : index
    %c0_5 = arith.constant 0 : index
    %7 = vector.load %arg6[%c0_4, %c0_5] : memref<8x1xf32, #tpu.memory_space<vmem>>, vector<8x1xf32>
    %8 = vector.broadcast %7 : vector<8x1xf32> to vector<8x256xf32>
    %9 = arith.addf %6, %8 : vector<8x256xf32>
    %cst = arith.constant 0.000000e+00 : f32
    %10 = vector.broadcast %cst : f32 to vector<8x256xf32>
    %c16_i32 = arith.constant 16 : i32
    %11 = tpu.dynamic_rotate %9 by %c16_i32 dim 1 : vector<8x256xf32>, i32 -> vector<8x256xf32>
    %c0_6 = arith.constant 0 : index
    %c0_7 = arith.constant 0 : index
    %12 = vector.load %arg2[%c0_6, %c0_7] : memref<3x256xf32, #tpu.memory_space<vmem>>, vector<1x256xf32>
    %13 = vector.broadcast %12 : vector<1x256xf32> to vector<8x256xf32>
    %14 = arith.mulf %11, %13 : vector<8x256xf32>
    %c0_8 = arith.constant 0 : index
    %c0_9 = arith.constant 0 : index
    %c0_10 = arith.constant 0 : index
    %15 = vector.load %arg3[%c0_8, %c0_9, %c0_10] : memref<3x8x8xf32, #tpu.memory_space<vmem>>, vector<1x8x8xf32>
    %16 = vector.shape_cast %15 : vector<1x8x8xf32> to vector<8x8xf32>
    %cst_11 = arith.constant dense<0.000000e+00> : vector<8x256xf32>
    %17 = tpu.matmul %16, %14, %cst_11 {dimension_numbers = #tpu.dot_dimension_numbers<[1], [0], [0], [1], [0, 0, 1, 1], [], []>} : vector<8x8xf32>, vector<8x256xf32>, vector<8x256xf32> -> vector<8x256xf32>
    %18 = arith.addf %10, %17 : vector<8x256xf32>
    %c1 = arith.constant 1 : index
    %c0_12 = arith.constant 0 : index
    %c0_13 = arith.constant 0 : index
    %19 = vector.load %arg3[%c1, %c0_12, %c0_13] : memref<3x8x8xf32, #tpu.memory_space<vmem>>, vector<1x8x8xf32>
    %20 = vector.shape_cast %19 : vector<1x8x8xf32> to vector<8x8xf32>
    %cst_14 = arith.constant dense<0.000000e+00> : vector<8x256xf32>
    %21 = tpu.matmul %20, %9, %cst_14 {dimension_numbers = #tpu.dot_dimension_numbers<[1], [0], [0], [1], [0, 0, 1, 1], [], []>} : vector<8x8xf32>, vector<8x256xf32>, vector<8x256xf32> -> vector<8x256xf32>
    %22 = arith.addf %18, %21 : vector<8x256xf32>
    %c240_i32 = arith.constant 240 : i32
    %23 = tpu.dynamic_rotate %9 by %c240_i32 dim 1 : vector<8x256xf32>, i32 -> vector<8x256xf32>
    %c2 = arith.constant 2 : index
    %c0_15 = arith.constant 0 : index
    %24 = vector.load %arg2[%c2, %c0_15] : memref<3x256xf32, #tpu.memory_space<vmem>>, vector<1x256xf32>
    %25 = vector.broadcast %24 : vector<1x256xf32> to vector<8x256xf32>
    %26 = arith.mulf %23, %25 : vector<8x256xf32>
    %c2_16 = arith.constant 2 : index
    %c0_17 = arith.constant 0 : index
    %c0_18 = arith.constant 0 : index
    %27 = vector.load %arg3[%c2_16, %c0_17, %c0_18] : memref<3x8x8xf32, #tpu.memory_space<vmem>>, vector<1x8x8xf32>
    %28 = vector.shape_cast %27 : vector<1x8x8xf32> to vector<8x8xf32>
    %cst_19 = arith.constant dense<0.000000e+00> : vector<8x256xf32>
    %29 = tpu.matmul %28, %26, %cst_19 {dimension_numbers = #tpu.dot_dimension_numbers<[1], [0], [0], [1], [0, 0, 1, 1], [], []>} : vector<8x8xf32>, vector<8x256xf32>, vector<8x256xf32> -> vector<8x256xf32>
    %30 = arith.addf %22, %29 : vector<8x256xf32>
    %c0_20 = arith.constant 0 : index
    %c0_21 = arith.constant 0 : index
    %31 = vector.load %arg4[%c0_20, %c0_21] : memref<8x1xf32, #tpu.memory_space<vmem>>, vector<8x1xf32>
    %32 = vector.broadcast %31 : vector<8x1xf32> to vector<8x256xf32>
    %33 = arith.addf %30, %32 : vector<8x256xf32>
    %cst_22 = arith.constant 0.000000e+00 : f32
    %34 = vector.broadcast %cst_22 : f32 to vector<8x256xf32>
    %35 = arith.maximumf %33, %34 : vector<8x256xf32>
    %c0_23 = arith.constant 0 : index
    %c0_24 = arith.constant 0 : index
    %36 = vector.load %arg7[%c0_23, %c0_24] : memref<8x256xf32, #tpu.memory_space<vmem>>, vector<8x256xf32>
    tpu.vector_store %arg7[%c0_23, %c0_24], %35 {strides = array<i32>} : memref<8x256xf32, #tpu.memory_space<vmem>>, vector<8x256xf32>,
    %c0_25 = arith.constant 0 : index
    %c0_26 = arith.constant 0 : index
    %37 = vector.load %arg8[%c0_25, %c0_26] : memref<8x1xf32, #tpu.memory_space<vmem>>, vector<8x1xf32>
    %cst_27 = arith.constant dense<0.000000e+00> : vector<8xf32>
    %38 = vector.multi_reduction <add>, %35, %cst_27 [1] : vector<8x256xf32> to vector<8xf32>
    %39 = vector.shape_cast %38 : vector<8xf32> to vector<8x1xf32>
    %40 = arith.addf %37, %39 : vector<8x1xf32>
    %c0_28 = arith.constant 0 : index
    %c0_29 = arith.constant 0 : index
    %41 = vector.load %arg8[%c0_28, %c0_29] : memref<8x1xf32, #tpu.memory_space<vmem>>, vector<8x1xf32>
    tpu.vector_store %arg8[%c0_28, %c0_29], %40 {strides = array<i32>} : memref<8x1xf32, #tpu.memory_space<vmem>>, vector<8x1xf32>,
    %c0_30 = arith.constant 0 : index
    %c0_31 = arith.constant 0 : index
    %42 = vector.load %arg9[%c0_30, %c0_31] : memref<8x1xf32, #tpu.memory_space<vmem>>, vector<8x1xf32>
    %43 = arith.mulf %35, %35 : vector<8x256xf32>
    %cst_32 = arith.constant dense<0.000000e+00> : vector<8xf32>
    %44 = vector.multi_reduction <add>, %43, %cst_32 [1] : vector<8x256xf32> to vector<8xf32>
    %45 = vector.shape_cast %44 : vector<8xf32> to vector<8x1xf32>
    %46 = arith.addf %42, %45 : vector<8x1xf32>
    %c0_33 = arith.constant 0 : index
    %c0_34 = arith.constant 0 : index
    %47 = vector.load %arg9[%c0_33, %c0_34] : memref<8x1xf32, #tpu.memory_space<vmem>>, vector<8x1xf32>
    tpu.vector_store %arg9[%c0_33, %c0_34], %46 {strides = array<i32>} : memref<8x1xf32, #tpu.memory_space<vmem>>, vector<8x1xf32>,
    return
  }
  func.func @transform_0(%arg0: i32) -> (i32, i32) {
    %c0_i32 = arith.constant 0 : i32
    %c0_i32_0 = arith.constant 0 : i32
    return %c0_i32, %arg0 : i32, i32
  }
  func.func @transform_1(%arg0: i32) -> (i32, i32) {
    %c0_i32 = arith.constant 0 : i32
    %c0_i32_0 = arith.constant 0 : i32
    %c0_i32_1 = arith.constant 0 : i32
    return %c0_i32, %c0_i32_0 : i32, i32
  }
  func.func @transform_2(%arg0: i32) -> (i32, i32, i32) {
    %c0_i32 = arith.constant 0 : i32
    %c0_i32_0 = arith.constant 0 : i32
    %c0_i32_1 = arith.constant 0 : i32
    %c0_i32_2 = arith.constant 0 : i32
    return %c0_i32, %c0_i32_0, %c0_i32_1 : i32, i32, i32
  }
  func.func @transform_3(%arg0: i32) -> (i32, i32) {
    %c0_i32 = arith.constant 0 : i32
    %c0_i32_0 = arith.constant 0 : i32
    %c0_i32_1 = arith.constant 0 : i32
    return %c0_i32, %c0_i32_0 : i32, i32
  }
  func.func @transform_4(%arg0: i32) -> (i32, i32) {
    %c0_i32 = arith.constant 0 : i32
    %c0_i32_0 = arith.constant 0 : i32
    %c0_i32_1 = arith.constant 0 : i32
    return %c0_i32, %c0_i32_0 : i32, i32
  }
  func.func @transform_5(%arg0: i32) -> (i32, i32) {
    %c0_i32 = arith.constant 0 : i32
    %c0_i32_0 = arith.constant 0 : i32
    %c0_i32_1 = arith.constant 0 : i32
    return %c0_i32, %c0_i32_0 : i32, i32
  }
  func.func @transform_6(%arg0: i32) -> (i32, i32) {
    %c0_i32 = arith.constant 0 : i32
    %c0_i32_0 = arith.constant 0 : i32
    return %c0_i32, %arg0 : i32, i32
  }
  func.func @transform_7(%arg0: i32) -> (i32, i32) {
    %c0_i32 = arith.constant 0 : i32
    %c0_i32_0 = arith.constant 0 : i32
    %c0_i32_1 = arith.constant 0 : i32
    return %c0_i32, %c0_i32_0 : i32, i32
  }
  func.func @transform_8(%arg0: i32) -> (i32, i32) {
    %c0_i32 = arith.constant 0 : i32
    %c0_i32_0 = arith.constant 0 : i32
    %c0_i32_1 = arith.constant 0 : i32
    return %c0_i32, %c0_i32_0 : i32, i32
  }
}

</mosaic_0001>

<bundles_post_ra>
// kernel: separated_conv.5
= control target key start
LH: loop header
LB: loop body
LE: loop exit
PB: predicated region body
PF: predicated region fallthrough
CT: control target
= control target key end

     0   :  { %s283_s12 = smov 0   ;;  %s300_s0 = inlined_call_operand.vmem [shape: f32[8,512], index: 0, kind: input, shape index: {}]   ;;  %s301_s1 = inlined_call_operand.vmem [shape: f32[8,1], index: 1, kind: input, shape index: {}]   ;;  %s302_s2 = inlined_call_operand.vmem [shape: f32[8,1], index: 2, kind: input, shape index: {}]   ;;  %s303_s3 = inlined_call_operand.vmem [shape: f32[8,512], index: 3, kind: output, shape index: {}]  }
   0x1 LB: > { %s235_s13 = sadd.s32 4294967295, %s260_s12   ;;  %p239_p0 = scmp.ge.s32.totalorder %s260_s12, 1  ;;  %s260_s12 = sphi %s283_s12, %s13_s12  }
   0x2   : > { %p136_p1 = scmp.lt.s32.totalorder %s260_s12, 5 }
   0x4   : > { %p137_p2 = pnand %p239_p0, %p136_p1 }
   0x5   : > { %p158_p3 = scmp.lt.s32.totalorder (!%p137_p2), %s235_s13, 3 }
   0x6   : > { %140 = sbr.rel (%p137_p2) target bundleno = 139 (0x8b), region = 32 }
   0xb   : > { %v167_v0 = vld [vmem:[%s301_s1] sm:$0xff]  ;;  %v262_v1 = vmov 0   ;;  %s305_s13 = smov (!%p158_p3, %s235_s13), 3 }
   0xc   : > { %253 = vset.pattern.permute.xlu0 %v262_v1  ;;  %v174_v2 = vld [vmem:[%s302_s2] sm:$0xff]  ;;  %s240_s18 = sshll.u32 %s305_s13, 3 }
   0xd   : > { %170 = vperm.xlu0 %253, %v167_v0   ;;  %s161_s21 = scalar_lea.vmem %s300_s0, %s240_s18  ;;  %s165_s24 = scalar_lea.vmem %s303_s3, %s240_s18 }
   0xe   : > { %v166_v4 = vld [vmem:[%s161_s21] sm:$0xff] }
  0x15   : > { %177 = vperm.xlu0 %253, %v174_v2  }
  0x7f   : > { %v171_v3 = vpop.permute.xlu0 %170 }
  0x80   : > { %v173_v5 = vmul.f32 %v171_v3, %v166_v4 }
  0x87   : > { %v178_v6 = vpop.permute.xlu0 %177 }
  0x88   : > { %v180_v7 = vadd.f32 %v178_v6, %v173_v5 }
  0x8a   : > { %181 = vst [vmem:[%s165_s24] sm:$0xff] %v180_v7 }
  0x8b PF: > { %s13_s12 = sadd.s32 1, %s260_s12  }
  0x8c   : > { %p10_p4 = scmp.ge.s32.totalorder %s13_s12, 6  }
  0x8e   :  { %12 = sbr.rel (!%p10_p4) target bundleno = 1 (0x1), region = 62 }

// kernel: separated_conv.3
= control target key start
LH: loop header
LB: loop body
LE: loop exit
PB: predicated region body
PF: predicated region fallthrough
CT: control target
= control target key end

     0   :  { %s564_s27 = smov 0   ;;  %s623_s0 = inlined_call_operand.vmem [shape: f32[8,512], index: 0, kind: input, shape index: {}]   ;;  %s624_s1 = inlined_call_operand.vmem [shape: f32[3,128], index: 1, kind: input, shape index: {}]   ;;  %s625_s2 = inlined_call_operand.vmem [shape: f32[3,8,8], index: 2, kind: input, shape index: {}]   ;;  %s626_s3 = inlined_call_operand.vmem [shape: f32[8,1], index: 3, kind: input, shape index: {}]   ;;  %s627_s4 = inlined_call_operand.vmem [shape: f32[8,1], index: 4, kind: input, shape index: {}]   ;;  %s628_s5 = inlined_call_operand.vmem [shape: f32[8,1], index: 5, kind: input, shape index: {}]   ;;  %s629_s6 = inlined_call_operand.vmem [shape: f32[8,512], index: 6, kind: output, shape index: {0}]   ;;  %s630_s7 = inlined_call_operand.vmem [shape: f32[8,1], index: 7, kind: output, shape index: {1}]   ;;  %s631_s8 = inlined_call_operand.vmem [shape: f32[8,1], index: 8, kind: output, shape index: {2}]  }
   0x1 LB: > { %s476_s4 = sadd.s32 4294967295, %s513_s27   ;;  %p480_p0 = scmp.ge.s32.totalorder %s513_s27, 1  ;;  %s513_s27 = sphi %s564_s27, %s19_s27  }
   0x2   : > { %p256_p1 = scmp.lt.s32.totalorder %s513_s27, 5 }
   0x4   : > { %p257_p2 = pnand %p480_p0, %p256_p1 }
   0x5   : > { %p288_p3 = scmp.lt.s32.totalorder (!%p257_p2), %s476_s4, 3  ;;  %p483_p4 = scmp.ne.s32.totalorder (!%p257_p2), %s476_s4, 0 }
   0x6   : > { %260 = sbr.rel (%p257_p2) target bundleno = 402 (0x192), region = 44 }
   0xb   : > { %s289_s5 = scalar_select %p288_p3, %s476_s4, 3 }
   0xc   : > { %299 = sbr.rel (%p483_p4) target bundleno = 20 (0x14), region = 48 }
   0xd   : > { %s481_s28 = sshll.u32 %s289_s5, 3 }
   0xe   : > { %s291_s9 = scalar_lea.vmem %s623_s0, %s481_s28  ;;  %s578_s12 = scalar_lea.vmem %s629_s6, %s481_s28 }
  0x11   : > { %vm300_vm0 = vcmask 7168   ;;  %v515_v0 = vmov 0.0  }
  0x12   : > { %301 = vst.msk [vmem:[%s630_s7] sm:$0xff] %vm300_vm0, %v515_v0 }
  0x13   : > { %302 = vst.msk [vmem:[%s631_s8] sm:$0xff] %vm300_vm0, %v515_v0 }
  0x14 PF: > { %v303_v1 = vld [vmem:[%s291_s9] sm:$0xff]  ;;  %s516_s17 = smov 127   ;;  %s517_s18 = smov 1   ;;  %vm312_vm1 = vcmask 64512   ;;  %v484_v2 = vld [vmem:[%s625_s2 + $0x8] sm:$0xff]  ;;  %v518_v4 = vmov 0  }
  0x15   : > { %359 = vrot.lane.b32.xlu0 %v303_v1, %s516_s17  ;;  %331 = vmatpush.msra.mxu0 %v303_v1  ;;  %v390_v3 = vld [vmem:[%s626_s3] sm:$0xff]  ;;  %v487_v8 = vld [vmem:[%s625_s2 + $0x10] sm:$0xff]  ;;  %vm403_vm2 = vcmask 7168  }
  0x16   : > { %485 = vmatmul.msk.f32.vlgmr.msra.gmra.mxu0 %vm312_vm1, %v484_v2  ;;  %503 = vset.pattern.permute.xlu1 %v518_v4  ;;  %v505_v5 = vld [vmem:[%s624_s1 + $0x2] ss:$0 sm:$0xff]  ;;  %v506_v9 = vld [vmem:[%s624_s1] ss:$0 sm:$0xff] }
  0x17   : > { %504 = vset.pattern.permute.xlu0 %v518_v4  ;;  %393 = vperm.xlu1 %503, %v390_v3   ;;  %v309_v12 = vld [vmem:[%s625_s2] sm:$0xff] }
  0x19   : > { %v399_v22 = vld [vmem:[%s630_s7] sm:$0xff] }
  0x1a   : > { %v405_v24 = vld [vmem:[%s631_s8] sm:$0xff] }
  0x1d   : > { %304 = vrot.lane.b32.xlu0 %v303_v1, %s517_s18 }
  0x87   : > { %v360_v6 = vpop.permute.xlu0 %359 }
  0x88   : > { %v363_v7 = vmul.f32 %v505_v5, %v360_v6 }
  0x89   : > { %v394_v17 = vpop.permute.xlu1 %393 }
  0x8a   : > { %384 = vmatpush.msra.mxu2 %v363_v7 }
  0x8b   : > { %488 = vmatmul.msk.f32.vlgmr.msra.gmra.mxu2 %vm312_vm1, %v487_v8 }
  0x8f   : > { %v305_v10 = vpop.permute.xlu0 %304 }
  0x90   : > { %v308_v11 = vmul.f32 %v506_v9, %v305_v10 }
  0x92   : > { %354 = vmatpush.msra.mxu1 %v308_v11 }
  0x93   : > { %486 = vmatmul.msk.f32.vlgmr.msra.gmra.mxu1 %vm312_vm1, %v309_v12  ;;  %v333_v13 = vpop.f32.mrf.mxu0 }
 0x10e   : > { %v386_v15 = vpop.f32.mrf.mxu2 }
 0x110   : > { %v356_v14 = vpop.f32.mrf.mxu1 }
 0x111   : > { %v357_v16 = vadd.f32 %v356_v14, %v333_v13 }
 0x113   : > { %v389_v18 = vadd.f32 %v386_v15, %v357_v16 }
 0x115   : > { %v396_v19 = vadd.f32 %v394_v17, %v389_v18 }
 0x117   : > { %v397_v20 = vmax.f32 %v396_v19, 0.0 }
 0x119   : > { %398 = vst [vmem:[%s578_s12] sm:$0xff] %v397_v20  ;;  %400 = vadd.xlane.f32.xlu1 %v397_v20  ;;  %v406_v21 = vmul.f32 %v397_v20, %v397_v20 }
 0x11b   : > { %407 = vadd.xlane.f32.xlu2 %v406_v21 }
 0x18c   : > { %v401_v23 = vpop.xlane.xlu1 %400 }
 0x18d   : > { %v402_v25 = vadd.f32 %v401_v23, %v399_v22 }
 0x18e   : > { %v408_v26 = vpop.xlane.xlu2 %407 }
 0x18f   : > { %404 = vst.msk [vmem:[%s630_s7] sm:$0xff] %vm403_vm2, %v402_v25  ;;  %v409_v27 = vadd.f32 %v408_v26, %v405_v24 }
 0x191   : > { %410 = vst.msk [vmem:[%s631_s8] sm:$0xff] %vm403_vm2, %v409_v27 }
 0x192 PF: > { %s19_s27 = sadd.s32 1, %s513_s27  }
 0x193   : > { %p16_p5 = scmp.ge.s32.totalorder %s19_s27, 6  }
 0x195   :  { %18 = sbr.rel (!%p16_p5) target bundleno = 1 (0x1), region = 96 }

// kernel: separated_conv.4
= control target key start
LH: loop header
LB: loop body
LE: loop exit
PB: predicated region body
PF: predicated region fallthrough
CT: control target
= control target key end

     0   :  { %s685_s27 = smov 0   ;;  %s754_s0 = inlined_call_operand.vmem [shape: f32[8,512], index: 0, kind: input, shape index: {}]   ;;  %s755_s1 = inlined_call_operand.vmem [shape: f32[3,256], index: 1, kind: input, shape index: {}]   ;;  %s756_s2 = inlined_call_operand.vmem [shape: f32[3,8,8], index: 2, kind: input, shape index: {}]   ;;  %s757_s3 = inlined_call_operand.vmem [shape: f32[8,1], index: 3, kind: input, shape index: {}]   ;;  %s758_s4 = inlined_call_operand.vmem [shape: f32[8,1], index: 4, kind: input, shape index: {}]   ;;  %s759_s5 = inlined_call_operand.vmem [shape: f32[8,1], index: 5, kind: input, shape index: {}]   ;;  %s760_s6 = inlined_call_operand.vmem [shape: f32[8,512], index: 6, kind: output, shape index: {0}]   ;;  %s761_s7 = inlined_call_operand.vmem [shape: f32[8,1], index: 7, kind: output, shape index: {1}]   ;;  %s762_s8 = inlined_call_operand.vmem [shape: f32[8,1], index: 8, kind: output, shape index: {2}]  }
   0x1 LB: > { %s594_s28 = sadd.s32 4294967295, %s634_s27   ;;  %p598_p0 = scmp.ge.s32.totalorder %s634_s27, 1  ;;  %s634_s27 = sphi %s685_s27, %s19_s27  }
   0x2   : > { %p258_p1 = scmp.lt.s32.totalorder %s634_s27, 3 }
   0x4   : > { %p259_p2 = pnand %p598_p0, %p258_p1 }
   0x5   : > { %s599_s29 = sshll.u32 (!%p259_p2), %s594_s28, 1  ;;  %p603_p4 = scmp.ne.s32.totalorder (!%p259_p2), %s594_s28, 0 }
   0x6   : > { %262 = sbr.rel (%p259_p2) target bundleno = 537 (0x219), region = 44  ;;  %p293_p3 = scmp.lt.s32.totalorder (!%p259_p2), %s599_s29, 3 }
   0xb   : > { %s764_s29 = smov (!%p293_p3, %s599_s29), 3  ;;  %307 = sbr.rel (%p603_p4) target bundleno = 19 (0x13), region = 48 }
   0xc   : > { %s600_s30 = sshll.u32 %s764_s29, 3 }
   0xd   : > { %s296_s11 = scalar_lea.vmem %s754_s0, %s600_s30  ;;  %s699_s14 = scalar_lea.vmem %s760_s6, %s600_s30 }
  0x10   : > { %vm308_vm0 = vcmask 7168   ;;  %v636_v0 = vmov 0.0  }
  0x11   : > { %309 = vst.msk [vmem:[%s761_s7] sm:$0xff] %vm308_vm0, %v636_v0 }
  0x12   : > { %310 = vst.msk [vmem:[%s762_s8] sm:$0xff] %vm308_vm0, %v636_v0 }
  0x13 PF: > { %v313_v1 = vld [vmem:[%s758_s4] sm:$0xff]  ;;  %v637_v2 = vmov 0   ;;  %v312_v7 = vld [vmem:[%s296_s11 + $0x8] sm:$0xff]  ;;  %s638_s25 = smov 112   ;;  %s639_s26 = smov 16   ;;  %v333_v13 = vlaneseq  ;;  %vm349_vm1 = vcmask 64512  }
  0x14   : > { %627 = vset.pattern.permute.xlu0 %v637_v2  ;;  %v321_v3 = vld [vmem:[%s759_s5] sm:$0xff]  ;;  %v604_v17 = vld [vmem:[%s756_s2 + $0x8] sm:$0xff]  ;;  %v610_v25 = vld [vmem:[%s756_s2 + $0x10] sm:$0xff]  ;;  %vm516_vm4 = vcmask 7168  }
  0x15   : > { %316 = vperm.xlu0 %627, %v313_v1   ;;  %v499_v4 = vld [vmem:[%s757_s3] sm:$0xff]  ;;  %v334_v15 = vand.u32 127, %v333_v13 }
  0x16   : > { %v311_v6 = vld [vmem:[%s296_s11] sm:$0xff] }
  0x17   : > { %v609_v16 = vld [vmem:[%s755_s1 + $0x2] ss:$4 sm:$0x3]  ;;  %vm440_vm2 = vcmp.lt.s32.totalorder %v334_v15, 112  ;;  %vm335_vm3 = vcmp.lt.s32.totalorder %v334_v15, 16 }
  0x18   : > { %v446_v18 = vperm.slane %v609_v16, 0  ;;  %v447_v19 = vperm.slane %v609_v16, 1  ;;  %v338_v27 = vld [vmem:[%s755_s1] ss:$4 sm:$0x3] }
  0x19   : > { %v340_v28 = vperm.slane %v338_v27, 0  ;;  %v341_v29 = vperm.slane %v338_v27, 1  ;;  %v346_v35 = vld [vmem:[%s756_s2] sm:$0xff] }
  0x1a   : > { %v511_v55 = vld [vmem:[%s761_s7] sm:$0xff] }
  0x1b   : > { %v518_v57 = vld [vmem:[%s762_s8] sm:$0xff] }
  0x1d   : > { %324 = vperm.xlu0 %627, %v321_v3  }
  0x25   : > { %502 = vperm.xlu0 %627, %v499_v4  }
  0x87   : > { %v317_v5 = vpop.permute.xlu0 %316 }
  0x88   : > { %v319_v8 = vmul.f32 %v317_v5, %v311_v6  ;;  %v320_v9 = vmul.f32 %v317_v5, %v312_v7 }
  0x8f   : > { %v325_v10 = vpop.permute.xlu0 %324 }
  0x90   : > { %v327_v11 = vadd.f32 %v325_v10, %v319_v8  ;;  %v328_v12 = vadd.f32 %v325_v10, %v320_v9 }
  0x92   : > { %388 = vmatpush.msra.mxu1 %v328_v12  ;;  %436 = vrot.lane.b32.xlu2 %v327_v11, %s638_s25 }
  0x93   : > { %329 = vrot.lane.b32.xlu1 %v327_v11, %s639_s26  ;;  %368 = vmatpush.msra.mxu0 %v327_v11 }
  0x94   : > { %605 = vmatmul.msk.f32.vlgmr.msra.gmra.mxu0 %vm349_vm1, %v604_v17  ;;  %606 = vmatmul.msk.f32.vlgmr.msra.gmra.mxu1 %vm349_vm1, %v604_v17 }
  0x97   : > { %v503_v46 = vpop.permute.xlu0 %502 }
  0x9a   : > { %438 = vrot.lane.b32.xlu2 %v328_v12, %s638_s25 }
  0x9b   : > { %331 = vrot.lane.b32.xlu1 %v328_v12, %s639_s26 }
  0xec   : > { %v437_v14 = vpop.permute.xlu2 %436 }
  0xf4   : > { %v439_v20 = vpop.permute.xlu2 %438 }
  0xf5   : > { %v441_v21 = vsel %vm440_vm2, %v437_v14, %v439_v20  ;;  %v442_v22 = vsel %vm440_vm2, %v439_v20, %v437_v14 }
  0xf6   : > { %v450_v23 = vmul.f32 %v446_v18, %v441_v21  ;;  %v451_v24 = vmul.f32 %v447_v19, %v442_v22 }
  0xf8   : > { %472 = vmatpush.msrb.mxu0 %v450_v23  ;;  %492 = vmatpush.msrb.mxu1 %v451_v24 }
  0xf9   : > { %611 = vmatmul.msk.f32.vlgmr.msrb.gmra.mxu0 %vm349_vm1, %v610_v25  ;;  %612 = vmatmul.msk.f32.vlgmr.msrb.gmra.mxu1 %vm349_vm1, %v610_v25 }
 0x105   : > { %v330_v26 = vpop.permute.xlu1 %329 }
 0x10d   : > { %v332_v30 = vpop.permute.xlu1 %331 }
 0x10e   : > { %v337_v31 = vsel %vm335_vm3, %v332_v30, %v330_v26  ;;  %v336_v32 = vsel %vm335_vm3, %v330_v26, %v332_v30 }
 0x10f   : > { %v344_v33 = vmul.f32 %v340_v28, %v337_v31  ;;  %v345_v34 = vmul.f32 %v341_v29, %v336_v32 }
 0x111   : > { %411 = vmatpush.msra.mxu2 %v344_v33  ;;  %431 = vmatpush.msra.mxu3 %v345_v34  ;;  %v370_v36 = vpop.f32.mrf.mxu0  ;;  %v390_v37 = vpop.f32.mrf.mxu1 }
 0x112   : > { %607 = vmatmul.msk.f32.vlgmr.msra.gmra.mxu2 %vm349_vm1, %v346_v35  ;;  %608 = vmatmul.msk.f32.vlgmr.msra.gmra.mxu3 %vm349_vm1, %v346_v35 }
 0x176   : > { %v474_v38 = vpop.f32.mrf.mxu0  ;;  %v494_v39 = vpop.f32.mrf.mxu1 }
 0x195   : > { %v413_v40 = vpop.f32.mrf.mxu2  ;;  %v433_v41 = vpop.f32.mrf.mxu3 }
 0x196   : > { %v414_v42 = vadd.f32 %v413_v40, %v370_v36  ;;  %v434_v43 = vadd.f32 %v433_v41, %v390_v37 }
 0x198   : > { %v497_v44 = vadd.f32 %v474_v38, %v414_v42  ;;  %v498_v45 = vadd.f32 %v494_v39, %v434_v43 }
 0x19a   : > { %v505_v47 = vadd.f32 %v503_v46, %v497_v44  ;;  %v506_v48 = vadd.f32 %v503_v46, %v498_v45 }
 0x19c   : > { %v507_v49 = vmax.f32 %v505_v47, 0.0  ;;  %v508_v50 = vmax.f32 %v506_v48, 0.0 }
 0x19e   : > { %509 = vst [vmem:[%s699_s14] sm:$0xff] %v507_v49  ;;  %v512_v51 = vadd.f32 %v508_v50, %v507_v49  ;;  %v519_v52 = vmul.f32 %v507_v49, %v507_v49  ;;  %v520_v53 = vmul.f32 %v508_v50, %v508_v50 }
 0x19f   : > { %510 = vst [vmem:[%s699_s14 + $0x8] sm:$0xff] %v508_v50 }
 0x1a0   : > { %513 = vadd.xlane.f32.xlu1 %v512_v51  ;;  %v521_v54 = vadd.f32 %v520_v53, %v519_v52 }
 0x1a2   : > { %522 = vadd.xlane.f32.xlu2 %v521_v54 }
 0x213   : > { %v514_v56 = vpop.xlane.xlu1 %513 }
 0x214   : > { %v515_v58 = vadd.f32 %v514_v56, %v511_v55 }
 0x215   : > { %v523_v59 = vpop.xlane.xlu2 %522 }
 0x216   : > { %517 = vst.msk [vmem:[%s761_s7] sm:$0xff] %vm516_vm4, %v515_v58  ;;  %v524_v60 = vadd.f32 %v523_v59, %v518_v57 }
 0x218   : > { %525 = vst.msk [vmem:[%s762_s8] sm:$0xff] %vm516_vm4, %v524_v60 }
 0x219 PF: > { %s19_s27 = sadd.s32 1, %s634_s27  }
 0x21a   : > { %p16_p5 = scmp.ge.s32.totalorder %s19_s27, 4  }
 0x21c   :  { %18 = sbr.rel (!%p16_p5) target bundleno = 1 (0x1), region = 97 }

</bundles_post_ra>
